<compile_context>
chip_gen: v7x
topology: tpu7x:2x2x1
jax: 0.10.0
libtpu: 0.0.40
codegen_flags: <defaults>
</compile_context>

<pallas_src>
import jax
import jax.numpy as jnp
from jax.experimental import pallas as pl
from jax.experimental.pallas import tpu as pltpu


def _convt_bn_silu_kernel(x_ref, w_ref, b_ref, o_ref):
    # x_ref: (1, C1, TN)   input pixels, channels-major (direct NCHW slice)
    # w_ref: (CO, C1)      ConvTranspose2d weight^T with BN scale pre-folded
    # b_ref: (CO, 1)       BN bias per output column (co, i, j), f32
    # o_ref: (1, CO, TN)   lane-dense output tile (TN is a multiple of 128)
    x = x_ref[0]                                                   # (C1, TN)
    acc = jnp.dot(w_ref[...], x, preferred_element_type=jnp.float32)  # (CO, TN) f32
    y = acc + b_ref[...]                                           # bias broadcast along lanes
    o_ref[0] = (y * jax.nn.sigmoid(y)).astype(o_ref.dtype)         # SiLU, cast at store


def _pick_tile(hw, max_tn=2048):
    """Largest multiple of 128 that divides hw and is <= max_tn (None if hw % 128 != 0)."""
    best = None
    t = 128
    while t <= min(hw, max_tn):
        if hw % t == 0:
            best = t
        t += 128
    return best


def conv_transpose_bn_silu(x, weight, gamma, beta, running_mean, running_var,
                           *, k=2, s=2, p=0, eps=1e-5, max_tn=2048):
    """x: (N, C1, H, W) NCHW; weight: (C1, C2, k, k) (PyTorch ConvTranspose2d layout)."""
    assert k == s and p == 0, "kernel specialized for k == s, p == 0 (module defaults)"
    # TODO(synk): general k != s / p != 0 transposed conv (overlapping scatter-add) not implemented.
    N, C1, H, W = x.shape
    C1w, C2, kh, kw = weight.shape
    assert C1w == C1 and kh == k and kw == k

    HW = H * W
    CO = C2 * kh * kw

    # --- spatial (lane) tile selection; pad H*W only if it is not a multiple of 128.
    x3 = x.reshape(N, C1, HW)          # free reshape, no data movement (NCHW is contiguous)
    tn = _pick_tile(HW, max_tn)
    HWp = HW
    if tn is None:
        HWp = ((HW + 127) // 128) * 128
        x3 = jnp.pad(x3, ((0, 0), (0, 0), (0, HWp - HW)))
        tn = _pick_tile(HWp, max_tn)

    # --- eval-mode BatchNorm folded into the weight (scale) and a per-column bias.
    scale_c = gamma / jnp.sqrt(running_var + eps)                  # (C2,)
    bias_c = beta - running_mean * scale_c                         # (C2,)
    scale_co = jnp.repeat(scale_c, kh * kw)                        # (CO,)  column order (co, i, j)
    bias_co = jnp.repeat(bias_c, kh * kw).reshape(CO, 1).astype(jnp.float32)
    w_t = (weight.reshape(C1, CO).T * scale_co[:, None]).astype(x.dtype)   # (CO, C1)

    grid = (N, HWp // tn)

    # --- explicit scoped-VMEM budget (double-buffered tiles + resident weight/bias),
    #     generous headroom, capped at 48 MiB (safe on v7x's 64 MiB per-TC VMEM).
    itemsize = jnp.dtype(x.dtype).itemsize
    est = 2 * (max(C1, 8) * tn * itemsize       # x tile (sublane-padded), double-buffered
               + CO * tn * itemsize)            # out tile, double-buffered
    est += 2 * (CO * max(C1, 128) * itemsize    # weight (lane-padded)
                + CO * 128 * 4)                 # bias
    vmem_limit = int(min(48 * 2 ** 20, max(4 * est, 16 * 2 ** 20)))

    out3 = pl.pallas_call(
        _convt_bn_silu_kernel,
        out_shape=jax.ShapeDtypeStruct((N, CO, HWp), x.dtype),
        grid_spec=pltpu.PrefetchScalarGridSpec(
            num_scalar_prefetch=0,
            grid=grid,
            in_specs=[
                pl.BlockSpec((1, C1, tn), lambda n, i: (n, 0, i)),   # x tile (NCHW slice)
                pl.BlockSpec((CO, C1), lambda n, i: (0, 0)),         # resident folded weight
                pl.BlockSpec((CO, 1), lambda n, i: (0, 0)),          # resident bias
            ],
            out_specs=pl.BlockSpec((1, CO, tn), lambda n, i: (n, 0, i)),
        ),
        compiler_params=pltpu.CompilerParams(
            dimension_semantics=("parallel", "parallel"),
            vmem_limit_bytes=vmem_limit),
    )(x3, w_t, bias_co)

    if HWp != HW:
        out3 = out3[:, :, :HW]

    # Glue: (N, CO, H*W) -> (N, C2, kh, kw, H, W) -> (N, C2, H, kh, W, kw) -> NCHW output.
    # TODO(synk): this k x k interleave transpose is the remaining wrapper-side HBM
    # round trip; fusing it needs strided/interleaved lane stores inside the kernel.
    out = out3.reshape(N, C2, kh, kw, H, W)
    out = jnp.transpose(out, (0, 1, 4, 2, 5, 3)).reshape(N, C2, H * kh, W * kw)
    return out


def _reference(x, weight, gamma, beta, running_mean, running_var, *, k=2, s=2, eps=1e-5):
    """Plain-JAX reference: explicit per-tap scatter (k == s, p == 0), eval BN, SiLU."""
    N, C1, H, W = x.shape
    _, C2, kh, kw = weight.shape
    y = jnp.zeros((N, C2, H * s, W * s), jnp.float32)
    for i in range(kh):
        for j in range(kw):
            contrib = jnp.einsum("nchw,cd->ndhw", x.astype(jnp.float32),
                                 weight[:, :, i, j].astype(jnp.float32))
            y = y.at[:, :, i::s, j::s].set(contrib)
    scale = (gamma / jnp.sqrt(running_var + eps))[None, :, None, None]
    bias = (beta - running_mean * gamma / jnp.sqrt(running_var + eps))[None, :, None, None]
    y = y * scale + bias
    return y * jax.nn.sigmoid(y)


if __name__ == "__main__":
    key = jax.random.PRNGKey(0)
    k_x, k_w, k_g, k_b, k_m, k_v = jax.random.split(key, 6)

    # Small shapes consistent with the module: N=2, c1=4, c2=8, H=W=16, k=s=2.
    N, C1, C2, H, W, K, S = 2, 4, 8, 16, 16, 2, 2

    x = jax.random.normal(k_x, (N, C1, H, W), jnp.float32)
    # ConvTranspose2d weight shape: (in_channels, out_channels, kH, kW)
    weight = jax.random.normal(k_w, (C1, C2, K, K), jnp.float32) * 0.1
    # BatchNorm2d params / running stats (deterministic, nontrivial).
    gamma = 1.0 + 0.1 * jax.random.normal(k_g, (C2,), jnp.float32)
    beta = 0.1 * jax.random.normal(k_b, (C2,), jnp.float32)
    running_mean = 0.1 * jax.random.normal(k_m, (C2,), jnp.float32)
    running_var = 1.0 + 0.1 * jax.random.uniform(k_v, (C2,), jnp.float32)

    out = conv_transpose_bn_silu(x, weight, gamma, beta, running_mean, running_var,
                                 k=K, s=S, p=0)
    out = jax.block_until_ready(out)

    ref = _reference(x, weight, gamma, beta, running_mean, running_var, k=K, s=S)
    assert out.shape == (N, C2, H * S, W * S), out.shape
    assert jnp.allclose(out, ref, atol=1e-5, rtol=1e-5), float(jnp.max(jnp.abs(out - ref)))

    print("KERNEL_OK")
</pallas_src>

<mosaic_0001>
module attributes {stable_mosaic.version = 11 : i64} {
  func.func @_convt_bn_silu_kernel(%arg0: i32, %arg1: i32, %arg2: memref<1x4x256xf32, #tpu.memory_space<vmem>>, %arg3: memref<32x4xf32, #tpu.memory_space<vmem>>, %arg4: memref<32x1xf32, #tpu.memory_space<vmem>>, %arg5: memref<1x32x256xf32, #tpu.memory_space<vmem>>) attributes {dimension_semantics = [#tpu.dimension_semantics<parallel>, #tpu.dimension_semantics<parallel>], iteration_bounds = array<i64: 2, 1>, scalar_prefetch = 0 : i64, scratch_operands = 0 : i64, tpu.core_type = #tpu.core_type<tc>, window_params = [{transform_indices = @transform_0, window_bounds = array<i64: 1, 4, 256>}, {pipeline_mode = #tpu.pipeline_mode<synchronous>, transform_indices = @transform_1, window_bounds = array<i64: 32, 4>}, {pipeline_mode = #tpu.pipeline_mode<synchronous>, transform_indices = @transform_2, window_bounds = array<i64: 32, 1>}, {transform_indices = @transform_3, window_bounds = array<i64: 1, 32, 256>}]} {
    %c0 = arith.constant 0 : index
    %c0_0 = arith.constant 0 : index
    %c0_1 = arith.constant 0 : index
    %0 = vector.load %arg2[%c0, %c0_0, %c0_1] : memref<1x4x256xf32, #tpu.memory_space<vmem>>, vector<1x4x256xf32>
    %1 = vector.shape_cast %0 : vector<1x4x256xf32> to vector<4x256xf32>
    %c0_2 = arith.constant 0 : index
    %c0_3 = arith.constant 0 : index
    %2 = vector.load %arg3[%c0_2, %c0_3] : memref<32x4xf32, #tpu.memory_space<vmem>>, vector<32x4xf32>
    %cst = arith.constant dense<0.000000e+00> : vector<32x256xf32>
    %3 = tpu.matmul %2, %1, %cst {dimension_numbers = #tpu.dot_dimension_numbers<[1], [0], [0], [1], [0, 0, 1, 1], [], []>} : vector<32x4xf32>, vector<4x256xf32>, vector<32x256xf32> -> vector<32x256xf32>
    %c0_4 = arith.constant 0 : index
    %c0_5 = arith.constant 0 : index
    %4 = vector.load %arg4[%c0_4, %c0_5] : memref<32x1xf32, #tpu.memory_space<vmem>>, vector<32x1xf32>
    %5 = vector.broadcast %4 : vector<32x1xf32> to vector<32x256xf32>
    %6 = arith.addf %3, %5 : vector<32x256xf32>
    %7 = arith.negf %6 : vector<32x256xf32>
    %8 = math.exp %7 : vector<32x256xf32>
    %cst_6 = arith.constant 1.000000e+00 : f32
    %9 = vector.broadcast %cst_6 : f32 to vector<32x256xf32>
    %10 = arith.addf %9, %8 : vector<32x256xf32>
    %11 = arith.divf %9, %10 : vector<32x256xf32>
    %12 = arith.mulf %6, %11 : vector<32x256xf32>
    %c0_7 = arith.constant 0 : index
    %c0_8 = arith.constant 0 : index
    %c0_9 = arith.constant 0 : index
    %13 = vector.load %arg5[%c0_7, %c0_8, %c0_9] : memref<1x32x256xf32, #tpu.memory_space<vmem>>, vector<1x32x256xf32>
    %14 = vector.shape_cast %13 : vector<1x32x256xf32> to vector<32x256xf32>
    %15 = vector.shape_cast %12 : vector<32x256xf32> to vector<1x32x256xf32>
    tpu.vector_store %arg5[%c0_7, %c0_8, %c0_9], %15 {strides = array<i32>} : memref<1x32x256xf32, #tpu.memory_space<vmem>>, vector<1x32x256xf32>,
    return
  }
  func.func @transform_0(%arg0: i32, %arg1: i32) -> (i32, i32, i32) {
    %c0_i32 = arith.constant 0 : i32
    %c0_i32_0 = arith.constant 0 : i32
    return %arg0, %c0_i32, %arg1 : i32, i32, i32
  }
  func.func @transform_1(%arg0: i32, %arg1: i32) -> (i32, i32) {
    %c0_i32 = arith.constant 0 : i32
    %c0_i32_0 = arith.constant 0 : i32
    %c0_i32_1 = arith.constant 0 : i32
    return %c0_i32, %c0_i32_0 : i32, i32
  }
  func.func @transform_2(%arg0: i32, %arg1: i32) -> (i32, i32) {
    %c0_i32 = arith.constant 0 : i32
    %c0_i32_0 = arith.constant 0 : i32
    %c0_i32_1 = arith.constant 0 : i32
    return %c0_i32, %c0_i32_0 : i32, i32
  }
  func.func @transform_3(%arg0: i32, %arg1: i32) -> (i32, i32, i32) {
    %c0_i32 = arith.constant 0 : i32
    %c0_i32_0 = arith.constant 0 : i32
    return %arg0, %c0_i32, %arg1 : i32, i32, i32
  }
}

</mosaic_0001>

<bundles_post_ra>
// kernel: tpu_custom_call.1
= control target key start
LH: loop header
LB: loop body
LE: loop exit
PB: predicated region body
PF: predicated region fallthrough
CT: control target
= control target key end

     0   :  { %8 = vsyncpa [#allocation3], 0  ;;  %s878_s0 = inlined_call_operand.vmem [shape: f32[2,4,256], index: 0, kind: input, shape index: {}]   ;;  %s879_s1 = inlined_call_operand.vmem [shape: f32[32,4], index: 1, kind: input, shape index: {}]   ;;  %s880_s2 = inlined_call_operand.vmem [shape: f32[32,1], index: 2, kind: input, shape index: {}]   ;;  %s881_s3 = inlined_call_operand.hbm [shape: f32[2,32,256], index: 3, kind: output, shape index: {}]  }
   0x1   :  { %10 = vsyncpa [#allocation3 + $0x1], 0  ;;  %s727_s12 = smov 0   ;;  %s729_s13 = smov 0  }
   0x2   :  { %s731_s14 = smov 0   ;;  %s733_s15 = smov 0  }
   0x3   :  { %s735_s16 = smov 0   ;;  %s737_s17 = smov 0  }
   0x4 LB: > { %s497_s18 = sadd.s32 4294967295, %s700_s17   ;;  %s498_s19 = sadd.s32 4294967294, %s700_s17   ;;  %s700_s17 = sphi %s737_s17, %s16_s17   ;;  %s696_s16 = sphi %s735_s16, %s888_s16   ;;  %s692_s15 = sphi %s733_s15, %s887_s15   ;;  %s688_s14 = sphi %s731_s14, %s886_s14   ;;  %s684_s13 = sphi %s729_s13, %s885_s13   ;;  %s680_s12 = sphi %s727_s12, %s884_s12  }
   0x5   : > { %s28_s20 = sadd.s32 1, %s696_s16  ;;  %s107_s21 = sadd.s32 1, %s688_s14 }
   0x6   : > { %p30_p0 = scmp.ge.s32.totalorder %s28_s20, 2  ;;  %p117_p1 = scmp.ne.s32.totalorder %s688_s14, %s684_s13 }
   0x7   : > { %p118_p2 = scmp.eq.s32.totalorder %s497_s18, 1  ;;  %p123_p3 = scmp.ne.s32.totalorder %s684_s13, %s680_s12 }
   0x8   : > { %s890_s20 = smov (%p30_p0, %s28_s20), 0  ;;  %p124_p5 = scmp.eq.s32.totalorder %s498_s19, 1 }
   0x9   : > { %p767_p4 = por %p118_p2, %p117_p1  ;;  %s102_s23 = ssub.s32 %s696_s16, %s890_s20 }
   0xa   : > { %p501_p6 = scmp.ge.s32.totalorder %s700_s17, 1  ;;  %p105_p7 = scmp.eq.s32.totalorder %s102_s23, 0 }
   0xb   : > { %p774_p8 = por %p124_p5, %p123_p3  ;;  %p161_p9 = scmp.lt.s32.totalorder %s700_s17, 3 }
   0xc   : > { %s780_s25 = scalar_select %p105_p7, %s688_s14, %s107_s21  }
   0xd   : > { %p162_p10 = pnand %p501_p6, %p161_p9 }
   0xe   : > { %p190_p11 = scmp.lt.s32.totalorder (!%p162_p10), %s692_s15, 1  ;;  %v702_v0 = vmov (!%p162_p10), 0.0   ;;  %v207_v1 = vld [vmem:[%s880_s2 + $0x10] sm:$0xff] (!%p162_p10)  ;;  %v703_v2 = vmov (!%p162_p10), 0   ;;  %v205_v3 = vld [vmem:[%s880_s2] sm:$0xff] (!%p162_p10)  ;;  %v208_v4 = vld [vmem:[%s880_s2 + $0x18] sm:$0xff] (!%p162_p10) }
   0xf   : > { %165 = sbr.rel (%p162_p10) target bundleno = 295 (0x127), region = 32  ;;  %313 = vmatprep.mubr.f32.mxu0 (!%p162_p10), %v702_v0  ;;  %325 = vmatprep.mubr.f32.mxu1 (!%p162_p10), %v702_v0  ;;  %v206_v5 = vld [vmem:[%s880_s2 + $0x8] sm:$0xff] (!%p162_p10)  ;;  %vm244_vm0 = vcmask (!%p162_p10), 1043456   ;;  %v201_v8 = vld [vmem:[%s879_s1] sm:$0xff] (!%p162_p10)  ;;  %vm231_vm1 = vcmask (!%p162_p10), 31744   ;;  %v203_v9 = vld [vmem:[%s879_s1 + $0x10] sm:$0xff] (!%p162_p10) }
  0x10   : > { %588 = vset.pattern.permute.xlu1 (!%p162_p10), %v703_v2  ;;  %587 = vset.pattern.permute.xlu0 (!%p162_p10), %v703_v2  ;;  %v202_v10 = vld [vmem:[%s879_s1 + $0x8] sm:$0xff] (!%p162_p10)  ;;  %v204_v11 = vld [vmem:[%s879_s1 + $0x18] sm:$0xff] (!%p162_p10)  ;;  %s186_s30 = sand.u32 (!%p162_p10), 1, %s684_s13   ;;  %s525_s6 = sshll.u32 (!%p162_p10), %s692_s15, 10 }
  0x11   : > { %221 = vperm.xlu1 (!%p162_p10), %588, %v207_v1   ;;  %211 = vperm.xlu0 (!%p162_p10), %587, %v205_v3   ;;  %s825_s10 = scalar_lea.hbm (!%p162_p10), %s881_s3, %s525_s6  ;;  %s704_s18 = smov (!%p162_p10), [#allocation2]  }
  0x12   : > { %s626_s19 = sshll.u32 (!%p162_p10), %s704_s18, 4  ;;  %s627_s19 = int_to_ptr.vmem [resolvable:$false] %s626_s19 }
  0x13   : > { %s628_s21 = scalar_lea.vmem (!%p162_p10), %s627_s19, 2048 }
  0x15   : > { %226 = vperm.xlu1 (!%p162_p10), %588, %v208_v4   ;;  %216 = vperm.xlu0 (!%p162_p10), %587, %v206_v5  }
  0x16   : > { %s191_s28 = scalar_select %p190_p11, %s692_s15, 1 }
  0x17   : > { %s832_s15 = scalar_lea.sflag [#allocation3], %s186_s30 }
  0x18   : > { %s524_s4 = sshll.u32 %s191_s28, 3 }
  0x19   : > { %s197_s11 = scalar_lea.vmem %s878_s0, %s524_s4  ;;  %s502_s4 = sshll.u32 %s186_s30, 6 }
  0x1a   : > { %v200_v6 = vld [vmem:[%s197_s11] sm:$0xff]  ;;  %s188_s5 = scalar_lea.vmem [#allocation2], %s502_s4 }
  0x1b   : > { %v230_v7 = vcombine.high %v200_v6, %v200_v6  ;;  %s418_s7 = sshll.u32 %s188_s5, 4  ;;  %s827_s7 = int_to_ptr.vmem [resolvable:$true] %s418_s7 }
  0x1c   : > { %s622_s11 = scalar_lea.vmem %s827_s7, 1024  ;;  %p629_p1 = scmp.lt.s32.totalorder %s827_s7, %s627_s19 }
  0x1d   : > { %505 = vmatprep.subr.msk.mxu0 %vm244_vm0, %v230_v7  ;;  %526 = vmatprep.subr.msk.mxu1 %vm244_vm0, %v230_v7  ;;  %p623_p12 = scmp.ne.s32.totalorder %s827_s7, %s622_s11  ;;  %p630_p2 = scmp.lt.s32.totalorder %s628_s21, %s622_s11 }
  0x1e   : > { %506 = vmatpush1.msk.msra.mxu0 %vm244_vm0, %v200_v6  ;;  %527 = vmatpush1.msk.msra.mxu1 %vm244_vm0, %v200_v6 }
  0x1f   : > { %507 = vmatmul.mubr.msk.f32.vlgmr.msra.gmra.mrb[0].mxu0 %vm231_vm1, %v201_v8  ;;  %509 = vmatmul.mubr.msk.f32.vlgmr.msra.gmra.mrb[0].mxu1 %vm231_vm1, %v203_v9  ;;  %p624_p13 = pnand %p623_p12, %p767_p4  ;;  %p631_p3 = por %p630_p2, %p629_p1 }
  0x20   : > { %319 = vmatprep.mubr.f32.mxu0 %v702_v0  ;;  %331 = vmatprep.mubr.f32.mxu1 %v702_v0 }
  0x21   : > { %p625_p0 = pneg %p624_p13 }
  0x23   : > { %508 = vmatmul.mubr.msk.f32.gmra.mrb[2].mxu0 %vm231_vm1, %v202_v10  ;;  %510 = vmatmul.mubr.msk.f32.gmra.mrb[2].mxu1 %vm231_vm1, %v204_v11  ;;  %p632_p5 = pnand %p631_p3, %p625_p0 }
  0x90   : > { %v222_v12 = vpop.permute.xlu1 %221  ;;  %v212_v13 = vpop.permute.xlu0 %211 }
  0x94   : > { %v227_v24 = vpop.permute.xlu1 %226  ;;  %v217_v25 = vpop.permute.xlu0 %216 }
  0xf2   : > { %v315_v14 = vpop.f32.mrb[0].mxu0  ;;  %v327_v15 = vpop.f32.mrb[0].mxu1 }
  0xf3   : > { %v316_v16 = vadd.f32 %v315_v14, %v212_v13  ;;  %v328_v17 = vadd.f32 %v327_v15, %v222_v12  ;;  %v317_v18 = vpop.f32.mrb[1].mxu0  ;;  %v329_v19 = vpop.f32.mrb[1].mxu1 }
  0xf4   : > { %v318_v20 = vadd.f32 %v317_v18, %v212_v13  ;;  %v811_v21 = vadd.f32 %v329_v19, %v222_v12 }
  0xf5   : > { %v511_v22 = vmul.f32 -1.442695, %v316_v16  ;;  %v515_v23 = vmul.f32 -1.442695, %v328_v17 }
  0xf6   : > { %v512_v26 = vmul.f32 -1.442695, %v318_v20  ;;  %v516_v27 = vmul.f32 -1.442695, %v811_v21  ;;  %v321_v28 = vpop.f32.mrb[2].mxu0  ;;  %v333_v29 = vpop.f32.mrb[2].mxu1 }
  0xf7   : > { %590 = vpow2.f32 %v511_v22  ;;  %v322_v30 = vadd.f32 %v321_v28, %v217_v25  ;;  %v334_v31 = vadd.f32 %v333_v29, %v227_v24  ;;  %v323_v32 = vpop.f32.mrb[3].mxu0  ;;  %v335_v33 = vpop.f32.mrb[3].mxu1 }
  0xf8   : > { %592 = vpow2.f32 %v515_v23  ;;  %v324_v34 = vadd.f32 %v323_v32, %v217_v25  ;;  %v814_v35 = vadd.f32 %v335_v33, %v227_v24 }
  0xf9   : > { %594 = vpow2.f32 %v512_v26  ;;  %v513_v36 = vmul.f32 -1.442695, %v322_v30  ;;  %v517_v37 = vmul.f32 -1.442695, %v334_v31 }
  0xfa   : > { %596 = vpow2.f32 %v516_v27  ;;  %v514_v38 = vmul.f32 -1.442695, %v324_v34  ;;  %v518_v39 = vmul.f32 -1.442695, %v814_v35 }
  0xfb   : > { %598 = vpow2.f32 %v513_v36 }
  0xfc   : > { %600 = vpow2.f32 %v517_v37 }
  0xfd   : > { %602 = vpow2.f32 %v514_v38 }
  0xfe   : > { %604 = vpow2.f32 %v518_v39 }
 0x101   : > { %v591_v40 = vpop.eup %590 }
 0x102   : > { %v593_v41 = vpop.eup %592  ;;  %v362_v42 = vadd.f32 1.0, %v591_v40 }
 0x103   : > { %v595_v43 = vpop.eup %594  ;;  %v366_v44 = vadd.f32 1.0, %v593_v41 }
 0x104   : > { %v597_v45 = vpop.eup %596  ;;  %606 = vrcp.f32 %v362_v42  ;;  %v363_v46 = vadd.f32 1.0, %v595_v43 }
 0x105   : > { %v599_v47 = vpop.eup %598  ;;  %608 = vrcp.f32 %v366_v44  ;;  %v367_v48 = vadd.f32 1.0, %v597_v45 }
 0x106   : > { %v601_v49 = vpop.eup %600  ;;  %610 = vrcp.f32 %v363_v46  ;;  %v364_v50 = vadd.f32 1.0, %v599_v47 }
 0x107   : > { %v603_v51 = vpop.eup %602  ;;  %612 = vrcp.f32 %v367_v48  ;;  %v368_v52 = vadd.f32 1.0, %v601_v49 }
 0x108   : > { %v605_v53 = vpop.eup %604  ;;  %614 = vrcp.f32 %v364_v50  ;;  %v365_v54 = vadd.f32 1.0, %v603_v51 }
 0x109   : > { %616 = vrcp.f32 %v368_v52  ;;  %v369_v55 = vadd.f32 1.0, %v605_v53 }
 0x10a   : > { %618 = vrcp.f32 %v365_v54 }
 0x10b   : > { %620 = vrcp.f32 %v369_v55 }
 0x10e   : > { %v607_v56 = vpop.eup %606 }
 0x10f   : > { %v609_v57 = vpop.eup %608  ;;  %v386_v58 = vmul.f32 %v607_v56, %v316_v16 }
 0x110   : > { %v611_v59 = vpop.eup %610  ;;  %v390_v60 = vmul.f32 %v609_v57, %v328_v17 }
 0x111   : > { %v613_v61 = vpop.eup %612  ;;  %394 = vst [vmem:[%s188_s5] sm:$0xff] %v386_v58  ;;  %v387_v62 = vmul.f32 %v611_v59, %v318_v20 }
 0x112   : > { %v615_v63 = vpop.eup %614  ;;  %398 = vst [vmem:[%s188_s5 + $0x20] sm:$0xff] %v390_v60  ;;  %v391_v0 = vmul.f32 %v613_v61, %v811_v21 }
 0x113   : > { %v617_v1 = vpop.eup %616  ;;  %395 = vst [vmem:[%s188_s5 + $0x8] sm:$0xff] %v387_v62  ;;  %v388_v2 = vmul.f32 %v615_v63, %v322_v30 }
 0x114   : > { %v619_v3 = vpop.eup %618  ;;  %399 = vst [vmem:[%s188_s5 + $0x28] sm:$0xff] %v391_v0  ;;  %v392_v4 = vmul.f32 %v617_v1, %v334_v31 }
 0x115   : > { %v621_v5 = vpop.eup %620  ;;  %396 = vst [vmem:[%s188_s5 + $0x10] sm:$0xff] %v388_v2  ;;  %v389_v6 = vmul.f32 %v619_v3, %v324_v34 }
 0x116   : > { %400 = vst [vmem:[%s188_s5 + $0x30] sm:$0xff] %v392_v4  ;;  %v393_v7 = vmul.f32 %v621_v5, %v814_v35 }
 0x117   : > { %397 = vst [vmem:[%s188_s5 + $0x18] sm:$0xff] %v389_v6 }
 0x118   : > { %401 = vst [vmem:[%s188_s5 + $0x38] sm:$0xff] %v393_v7 }
 0x119   : > { %635 = shalt.err (!%p632_p5)
}
 0x11a   : > { %s636_s23 = scalar_lea.hbm %s825_s10, 1024  ;;  %s640_s28 = scalar_lea.hbm %s881_s3, 2048 }
 0x11b   : > { %p637_p6 = scmp.ne.s32.totalorder %s825_s10, %s636_s23  ;;  %p641_p10 = scmp.lt.u32.totalorder %s825_s10, %s881_s3 }
 0x11c   : > { %p642_p11 = scmp.lt.u32.totalorder %s640_s28, %s636_s23  ;;  %p644_p13 = scmp.lt.u32.totalorder %s636_s23, %s825_s10 }
 0x11d   : > { %p638_p7 = pnand %p637_p6, %p767_p4 }
 0x11e   : > { %p643_p12 = por %p642_p11, %p641_p10 }
 0x11f   : > { %p639_p9 = pneg %p638_p7 }
 0x120   : > { %p645_p0 = por %p644_p13, %p643_p12 }
 0x122   : > { %p646_p1 = pnand %p645_p0, %p639_p9 }
 0x124   : > { %649 = shalt.err (!%p646_p1)
}
 0x125   : > { %s705_s4 = smov 256   ;;  %s706_s5 = smov 16  }
 0x126   : > { %528 = dma.vmem_to_hbm [thread:$0]  (%p767_p4), %s827_s7, 1024, %s825_s10, %s832_s15, %s705_s4, %s705_s4, %s706_s5  }
 0x127 PF: > { %p534_p2 = scmp.ge.s32.totalorder %s700_s17, 2  ;;  %s433_s6 = sand.u32 1, %s680_s12  }
 0x128   : > { %s434_s8 = scalar_lea.sflag [#allocation3], %s433_s6 }
 0x129   : > { %p531_p3 = pnand %p534_p2, %p774_p8 }
 0x12b   : > { %675 = dma.done.wait (!%p531_p3), %s434_s8, 1024  }
 0x12c   : > { %677 = vsyncadd (!%p531_p3), %s434_s8, 4294966272  ;;  %s16_s17 = sadd.s32 1, %s700_s17   ;;  %s884_s12 = smov %s684_s13 }
 0x12d   : > { %p13_p5 = scmp.ge.s32.totalorder %s16_s17, 4   ;;  %s885_s13 = smov %s688_s14 }
 0x12e   : > { %s886_s14 = smov %s780_s25  ;;  %s887_s15 = smov %s696_s16 }
 0x12f   : > { %s888_s16 = smov %s890_s20  ;;  %15 = sbr.rel (!%p13_p5) target bundleno = 4 (0x4), region = 67 }
 0x136   :  { %439 = vsyncpa [#allocation3], 1 }
 0x137   :  { %441 = vsyncpa [#allocation3 + $0x1], 1 }

</bundles_post_ra>
